<compile_context>
chip_gen: v7x
topology: tpu7x:2x2x1
jax: 0.10.0
libtpu: 0.0.40
codegen_flags: <defaults>
</compile_context>

<pallas_src>
import jax
import jax.numpy as jnp
from jax.experimental import pallas as pl
from jax.experimental.pallas import tpu as pltpu

EPS = 1e-5
VMEM_LIMIT = 32 * 1024 * 1024


def _round_up(x, m):
    return (x + m - 1) // m * m


# ------------------------------ Pallas kernels -------------------------------
def _gemm_stats_kernel(p_ref, w_ref, y_ref, sum_ref, sq_ref):
    """Pass A: bf16 GEMM (f32 accumulation) + per-tile partial BN statistics.

    p_ref   : (tm, K_pad)     bf16 im2col patches for this M-tile
    w_ref   : (K_pad, C_pad)  bf16 conv weights (HWIO flattened, zero-padded)
    y_ref   : (tm, C_pad)     f32 pre-BN activations (lane-dense store)
    sum_ref : (1, 1, C_pad)   per-tile sum(y)
    sq_ref  : (1, 1, C_pad)   per-tile sum(y*y)
    """
    y = jnp.dot(p_ref[...], w_ref[...], preferred_element_type=jnp.float32)
    y_ref[...] = y
    sum_ref[...] = jnp.sum(y, axis=0, keepdims=True).reshape(1, 1, -1)
    sq_ref[...] = jnp.sum(y * y, axis=0, keepdims=True).reshape(1, 1, -1)


def _bn_relu_kernel(y_ref, scale_ref, shift_ref, o_ref):
    """Pass B: y * scale + shift, then ReLU.  scale/shift fold gamma/mean/var."""
    o_ref[...] = jnp.maximum(y_ref[...] * scale_ref[...] + shift_ref[...], 0.0)


# ------------------------------- JAX wrapper ---------------------------------
def _im2col(x_nhwc, kh, kw, stride, pad, pad_mode):
    """Build (M, KH*KW*C) patch matrix.  Tap order (dy, dx, c) matches HWIO."""
    if pad > 0:
        x_nhwc = jnp.pad(x_nhwc, ((0, 0), (pad, pad), (pad, pad), (0, 0)),
                         mode=pad_mode)
    N, Hp, Wp, C = x_nhwc.shape
    Ho = (Hp - kh) // stride + 1
    Wo = (Wp - kw) // stride + 1
    cols = []
    for dy in range(kh):
        for dx in range(kw):
            sl = jax.lax.slice(
                x_nhwc,
                (0, dy, dx, 0),
                (N, dy + (Ho - 1) * stride + 1, dx + (Wo - 1) * stride + 1, C),
                (1, stride, stride, 1))
            cols.append(sl.reshape(N * Ho * Wo, C))
    return jnp.concatenate(cols, axis=1), (N, Ho, Wo)


def _conv_bn_relu_stage(x_nhwc, w_hwio, gamma, beta, *, stride, pad, pad_mode,
                        tm_cap=1024):
    kh, kw, cin, cout = w_hwio.shape
    patches, (N, Ho, Wo) = _im2col(x_nhwc.astype(jnp.float32),
                                   kh, kw, stride, pad, pad_mode)
    M, K = patches.shape

    K_pad = _round_up(K, 128)              # lane-dense contraction dim
    C_pad = _round_up(cout, 128)           # lane-dense output dim
    tm = min(tm_cap, _round_up(M, 8))      # M-tile rows (multiple of 8)
    M_pad = _round_up(M, tm)
    num_tiles = M_pad // tm

    # bf16 MXU inputs; zero padding contributes nothing to the GEMM or stats.
    patches_p = jnp.pad(patches.astype(jnp.bfloat16),
                        ((0, M_pad - M), (0, K_pad - K)))
    w_p = jnp.pad(w_hwio.reshape(K, cout).astype(jnp.bfloat16),
                  ((0, K_pad - K), (0, C_pad - cout)))

    cost = pl.CostEstimate(
        flops=2 * M_pad * K_pad * C_pad + 4 * M_pad * C_pad,
        transcendentals=0,
        bytes_accessed=2 * (M_pad * K_pad + K_pad * C_pad)
        + 4 * (M_pad * C_pad + 2 * num_tiles * C_pad))

    # ---- Pass A: tiled GEMM + partial statistics --------------------------
    y_pre, part_sum, part_sq = pl.pallas_call(
        _gemm_stats_kernel,
        out_shape=(
            jax.ShapeDtypeStruct((M_pad, C_pad), jnp.float32),
            jax.ShapeDtypeStruct((num_tiles, 1, C_pad), jnp.float32),
            jax.ShapeDtypeStruct((num_tiles, 1, C_pad), jnp.float32),
        ),
        grid_spec=pltpu.PrefetchScalarGridSpec(
            num_scalar_prefetch=0,
            grid=(num_tiles,),
            in_specs=[
                pl.BlockSpec((tm, K_pad), lambda i: (i, 0)),
                pl.BlockSpec((K_pad, C_pad), lambda i: (0, 0)),
            ],
            out_specs=[
                pl.BlockSpec((tm, C_pad), lambda i: (i, 0)),
                pl.BlockSpec((1, 1, C_pad), lambda i: (i, 0, 0)),
                pl.BlockSpec((1, 1, C_pad), lambda i: (i, 0, 0)),
            ],
        ),
        compiler_params=pltpu.CompilerParams(
            dimension_semantics=("parallel",),
            vmem_limit_bytes=VMEM_LIMIT),
        cost_estimate=cost,
    )(patches_p, w_p)

    # ---- Finalize BN statistics (tiny XLA reduce over tile partials) ------
    # Padded M rows and padded Cout columns contribute exact zeros; divide by
    # the true element count M.
    g_pad = jnp.pad(gamma.astype(jnp.float32), (0, C_pad - cout))
    bt_pad = jnp.pad(beta.astype(jnp.float32), (0, C_pad - cout))
    tot = jnp.sum(part_sum[:, 0, :], axis=0)
    tot_sq = jnp.sum(part_sq[:, 0, :], axis=0)
    mu = tot / M
    var = jnp.maximum(tot_sq / M - mu * mu, 0.0)       # biased variance
    scale = g_pad * jax.lax.rsqrt(var + EPS)
    shift = bt_pad - mu * scale

    # ---- Pass B: tiled normalize + ReLU ------------------------------------
    out = pl.pallas_call(
        _bn_relu_kernel,
        out_shape=jax.ShapeDtypeStruct((M_pad, C_pad), jnp.float32),
        grid_spec=pltpu.PrefetchScalarGridSpec(
            num_scalar_prefetch=0,
            grid=(num_tiles,),
            in_specs=[
                pl.BlockSpec((tm, C_pad), lambda i: (i, 0)),
                pl.BlockSpec((1, C_pad), lambda i: (0, 0)),
                pl.BlockSpec((1, C_pad), lambda i: (0, 0)),
            ],
            out_specs=pl.BlockSpec((tm, C_pad), lambda i: (i, 0)),
        ),
        compiler_params=pltpu.CompilerParams(
            dimension_semantics=("parallel",),
            vmem_limit_bytes=VMEM_LIMIT),
    )(y_pre, scale.reshape(1, C_pad), shift.reshape(1, C_pad))

    return out[:M, :cout].reshape(N, Ho, Wo, cout)


def ftgan_encoder_pallas(x_nchw, params, tm_cap=1024):
    """x_nchw: (N, Cin, H, W) float32.  Returns (N, 4*ngf, H//4, W//4)."""
    x = jnp.transpose(x_nchw, (0, 2, 3, 1)).astype(jnp.float32)   # -> NHWC
    # Conv biases (b1/b2/b3) are intentionally not used here: training-mode
    # BatchNorm mean subtraction cancels them exactly.
    y = _conv_bn_relu_stage(x, params["w1"], params["g1"], params["bt1"],
                            stride=1, pad=3, pad_mode="reflect", tm_cap=tm_cap)
    y = _conv_bn_relu_stage(y, params["w2"], params["g2"], params["bt2"],
                            stride=2, pad=1, pad_mode="constant", tm_cap=tm_cap)
    y = _conv_bn_relu_stage(y, params["w3"], params["g3"], params["bt3"],
                            stride=2, pad=1, pad_mode="constant", tm_cap=tm_cap)
    return jnp.transpose(y, (0, 3, 1, 2))                         # -> NCHW


# ----------------------------- pure-JAX reference ----------------------------
def _bn_relu_ref(y, gamma, beta):
    mu = jnp.mean(y, axis=(0, 1, 2), keepdims=True)
    var = jnp.mean((y - mu) ** 2, axis=(0, 1, 2), keepdims=True)
    y = (y - mu) * jax.lax.rsqrt(var + EPS) * gamma.reshape(1, 1, 1, -1) \
        + beta.reshape(1, 1, 1, -1)
    return jax.nn.relu(y)


def ftgan_encoder_ref(x_nchw, params):
    x = jnp.transpose(x_nchw, (0, 2, 3, 1)).astype(jnp.float32)

    def conv(inp, w, b, stride, pad, mode):
        p = jnp.pad(inp, ((0, 0), (pad, pad), (pad, pad), (0, 0)), mode=mode)
        y = jax.lax.conv_general_dilated(
            p, w, window_strides=(stride, stride), padding="VALID",
            dimension_numbers=("NHWC", "HWIO", "NHWC"),
            precision=jax.lax.Precision.HIGHEST)
        return y + b.reshape(1, 1, 1, -1)

    y = _bn_relu_ref(conv(x, params["w1"], params["b1"], 1, 3, "reflect"),
                     params["g1"], params["bt1"])
    y = _bn_relu_ref(conv(y, params["w2"], params["b2"], 2, 1, "constant"),
                     params["g2"], params["bt2"])
    y = _bn_relu_ref(conv(y, params["w3"], params["b3"], 2, 1, "constant"),
                     params["g3"], params["bt3"])
    return jnp.transpose(y, (0, 3, 1, 2))


if __name__ == "__main__":
    N, Cin, H, W = 2, 4, 16, 16
    ngf = 8                                    # small test-size ngf
    C1, C2, C3 = ngf, 2 * ngf, 4 * ngf

    key = jax.random.PRNGKey(0)
    keys = jax.random.split(key, 13)

    x = jax.random.normal(keys[0], (N, Cin, H, W), dtype=jnp.float32)
    params = {
        "w1": 0.1 * jax.random.normal(keys[1], (7, 7, Cin, C1), jnp.float32),
        "b1": 0.1 * jax.random.normal(keys[2], (C1,), jnp.float32),
        "g1": 1.0 + 0.1 * jax.random.normal(keys[3], (C1,), jnp.float32),
        "bt1": 0.1 * jax.random.normal(keys[4], (C1,), jnp.float32),
        "w2": 0.1 * jax.random.normal(keys[5], (3, 3, C1, C2), jnp.float32),
        "b2": 0.1 * jax.random.normal(keys[6], (C2,), jnp.float32),
        "g2": 1.0 + 0.1 * jax.random.normal(keys[7], (C2,), jnp.float32),
        "bt2": 0.1 * jax.random.normal(keys[8], (C2,), jnp.float32),
        "w3": 0.1 * jax.random.normal(keys[9], (3, 3, C2, C3), jnp.float32),
        "b3": 0.1 * jax.random.normal(keys[10], (C3,), jnp.float32),
        "g3": 1.0 + 0.1 * jax.random.normal(keys[11], (C3,), jnp.float32),
        "bt3": 0.1 * jax.random.normal(keys[12], (C3,), jnp.float32),
    }

    # tm_cap=128 exercises the multi-tile grid + cross-tile BN reduction even
    # at the small test size (stage 1 has M = 512 -> 4 M-tiles).
    out = jax.block_until_ready(ftgan_encoder_pallas(x, params, tm_cap=128))
    ref = jax.block_until_ready(ftgan_encoder_ref(x, params))

    assert out.shape == (N, C3, H // 4, W // 4), out.shape
    max_err = float(jnp.max(jnp.abs(out - ref)))
    # Tolerance accounts for bf16 MXU inputs (f32 accumulation) vs the
    # full-f32 HIGHEST-precision reference across three conv+BN stages.
    assert jnp.allclose(out, ref, atol=5e-2, rtol=5e-2), max_err

    print("KERNEL_OK")
</pallas_src>

<mosaic_0001>
module attributes {stable_mosaic.version = 11 : i64} {
  func.func @_gemm_stats_kernel(%arg0: i32, %arg1: memref<128x256xbf16, #tpu.memory_space<vmem>>, %arg2: memref<256x128xbf16, #tpu.memory_space<vmem>>, %arg3: memref<128x128xf32, #tpu.memory_space<vmem>>, %arg4: memref<1x1x128xf32, #tpu.memory_space<vmem>>, %arg5: memref<1x1x128xf32, #tpu.memory_space<vmem>>) attributes {dimension_semantics = [#tpu.dimension_semantics<parallel>], iteration_bounds = array<i64: 4>, scalar_prefetch = 0 : i64, scratch_operands = 0 : i64, tpu.core_type = #tpu.core_type<tc>, window_params = [{transform_indices = @transform_0, window_bounds = array<i64: 128, 256>}, {pipeline_mode = #tpu.pipeline_mode<synchronous>, transform_indices = @transform_1, window_bounds = array<i64: 256, 128>}, {transform_indices = @transform_2, window_bounds = array<i64: 128, 128>}, {transform_indices = @transform_3, window_bounds = array<i64: 1, 1, 128>}, {transform_indices = @transform_4, window_bounds = array<i64: 1, 1, 128>}]} {
    %c0 = arith.constant 0 : index
    %c0_0 = arith.constant 0 : index
    %0 = vector.load %arg1[%c0, %c0_0] : memref<128x256xbf16, #tpu.memory_space<vmem>>, vector<128x256xbf16>
    %c0_1 = arith.constant 0 : index
    %c0_2 = arith.constant 0 : index
    %1 = vector.load %arg2[%c0_1, %c0_2] : memref<256x128xbf16, #tpu.memory_space<vmem>>, vector<256x128xbf16>
    %cst = arith.constant dense<0.000000e+00> : vector<128x128xf32>
    %2 = tpu.matmul %0, %1, %cst {dimension_numbers = #tpu.dot_dimension_numbers<[1], [0], [0], [1], [0, 0, 1, 1], [], []>} : vector<128x256xbf16>, vector<256x128xbf16>, vector<128x128xf32> -> vector<128x128xf32>
    %c0_3 = arith.constant 0 : index
    %c0_4 = arith.constant 0 : index
    %3 = vector.load %arg3[%c0_3, %c0_4] : memref<128x128xf32, #tpu.memory_space<vmem>>, vector<128x128xf32>
    tpu.vector_store %arg3[%c0_3, %c0_4], %2 {strides = array<i32>} : memref<128x128xf32, #tpu.memory_space<vmem>>, vector<128x128xf32>,
    %cst_5 = arith.constant dense<0.000000e+00> : vector<128xf32>
    %4 = vector.multi_reduction <add>, %2, %cst_5 [0] : vector<128x128xf32> to vector<128xf32>
    %5 = vector.shape_cast %4 : vector<128xf32> to vector<1x128xf32>
    %6 = vector.shape_cast %5 : vector<1x128xf32> to vector<1x1x128xf32>
    %c0_6 = arith.constant 0 : index
    %c0_7 = arith.constant 0 : index
    %c0_8 = arith.constant 0 : index
    %7 = vector.load %arg4[%c0_6, %c0_7, %c0_8] : memref<1x1x128xf32, #tpu.memory_space<vmem>>, vector<1x1x128xf32>
    tpu.vector_store %arg4[%c0_6, %c0_7, %c0_8], %6 {strides = array<i32>} : memref<1x1x128xf32, #tpu.memory_space<vmem>>, vector<1x1x128xf32>,
    %8 = arith.mulf %2, %2 : vector<128x128xf32>
    %cst_9 = arith.constant dense<0.000000e+00> : vector<128xf32>
    %9 = vector.multi_reduction <add>, %8, %cst_9 [0] : vector<128x128xf32> to vector<128xf32>
    %10 = vector.shape_cast %9 : vector<128xf32> to vector<1x128xf32>
    %11 = vector.shape_cast %10 : vector<1x128xf32> to vector<1x1x128xf32>
    %c0_10 = arith.constant 0 : index
    %c0_11 = arith.constant 0 : index
    %c0_12 = arith.constant 0 : index
    %12 = vector.load %arg5[%c0_10, %c0_11, %c0_12] : memref<1x1x128xf32, #tpu.memory_space<vmem>>, vector<1x1x128xf32>
    tpu.vector_store %arg5[%c0_10, %c0_11, %c0_12], %11 {strides = array<i32>} : memref<1x1x128xf32, #tpu.memory_space<vmem>>, vector<1x1x128xf32>,
    return
  }
  func.func @transform_0(%arg0: i32) -> (i32, i32) {
    %c0_i32 = arith.constant 0 : i32
    %c0_i32_0 = arith.constant 0 : i32
    return %arg0, %c0_i32 : i32, i32
  }
  func.func @transform_1(%arg0: i32) -> (i32, i32) {
    %c0_i32 = arith.constant 0 : i32
    %c0_i32_0 = arith.constant 0 : i32
    %c0_i32_1 = arith.constant 0 : i32
    return %c0_i32, %c0_i32_0 : i32, i32
  }
  func.func @transform_2(%arg0: i32) -> (i32, i32) {
    %c0_i32 = arith.constant 0 : i32
    %c0_i32_0 = arith.constant 0 : i32
    return %arg0, %c0_i32 : i32, i32
  }
  func.func @transform_3(%arg0: i32) -> (i32, i32, i32) {
    %c0_i32 = arith.constant 0 : i32
    %c0_i32_0 = arith.constant 0 : i32
    %c0_i32_1 = arith.constant 0 : i32
    return %arg0, %c0_i32, %c0_i32_0 : i32, i32, i32
  }
  func.func @transform_4(%arg0: i32) -> (i32, i32, i32) {
    %c0_i32 = arith.constant 0 : i32
    %c0_i32_0 = arith.constant 0 : i32
    %c0_i32_1 = arith.constant 0 : i32
    return %arg0, %c0_i32, %c0_i32_0 : i32, i32, i32
  }
}

</mosaic_0001>

<bundles_post_ra>
// kernel: tpu_custom_call.1
= control target key start
LH: loop header
LB: loop body
LE: loop exit
PB: predicated region body
PF: predicated region fallthrough
CT: control target
= control target key end

     0   :  { %10 = vsyncpa [#allocation3], 0  ;;  %s1652_s0 = inlined_call_operand.hbm [shape: bf16[512,256], index: 0, kind: input, shape index: {}]   ;;  %s1653_s1 = inlined_call_operand.hbm [shape: bf16[256,128], index: 1, kind: input, shape index: {}]   ;;  %s1654_s2 = inlined_call_operand.hbm [shape: f32[512,128], index: 2, kind: output, shape index: {0}]   ;;  %s1655_s3 = inlined_call_operand.hbm [shape: f32[4,1,128], index: 3, kind: output, shape index: {1}]   ;;  %s1656_s4 = inlined_call_operand.hbm [shape: f32[4,1,128], index: 4, kind: output, shape index: {2}]  }
   0x1   :  { %12 = vsyncpa [#allocation3 + $0x1], 0 }
   0x2   :  { %13 = vsyncpa [#allocation6], 0 }
   0x3   :  { %14 = vsyncpa [#allocation4], 0 }
   0x4   :  { %16 = vsyncpa [#allocation4 + $0x1], 0 }
   0x5   :  { %17 = vsyncpa [#allocation9], 0 }
   0x6   :  { %19 = vsyncpa [#allocation9 + $0x1], 0  ;;  %s1305_s15 = smov 0   ;;  %s1307_s16 = smov 0  }
   0x7   :  { %s1309_s17 = smov 0   ;;  %s1311_s18 = smov 0  }
   0x8 LB: > { %s1326_s19 = sadd.s32 4294967295, %s1267_s18   ;;  %s832_s20 = sadd.s32 4294967294, %s1267_s18   ;;  %s1267_s18 = sphi %s1311_s18, %s1675_s18   ;;  %s1263_s17 = sphi %s1309_s17, %s1674_s17   ;;  %s1259_s16 = sphi %s1307_s16, %s1673_s16   ;;  %s1255_s15 = sphi %s1305_s15, %s1672_s15  }
   0x9   : > { %p45_p0 = scmp.ne.s32.totalorder %s1259_s16, %s1255_s15  ;;  %p1657_p1 = scmp.eq.s32.totalorder %s1326_s19, 0 }
   0xa   : > { %p96_p3 = scmp.eq.s32.totalorder %s832_s20, 3  ;;  %p833_p5 = scmp.ge.s32.totalorder %s1267_s18, 1 }
   0xb   : > { %p1337_p4 = por %p1657_p1, %p45_p0  ;;  %p155_p7 = scmp.lt.s32.totalorder %s1267_s18, 5 }
   0xc   : > { %p1342_p6 = por %p96_p3, %p45_p0  ;;  %s1269_s24 = smov [#allocation5]  }
   0xd   : > { %s1660_s21 = scalar_select %p1337_p4, 1, 0 }
   0xe   : > { %s1661_s22 = scalar_select %p1342_p6, 1, 0 }
   0xf   : > { %p1347_p8 = pnand %p833_p5, %p155_p7  ;;  %s167_s25 = sshll.u32 %s1269_s24, 4  ;;  %s168_s25 = int_to_ptr.vmem [resolvable:$true] %s167_s25 }
  0x10   : > { %s1360_s27 = sadd.s32 1, %s1267_s18   ;;  %s32_s28 = sadd.s32 1, %s1263_s17 }
  0x11   : > { %s1662_s23 = scalar_select %p1347_p8, 1, 0 }
  0x12   : > { %p978_p9 = pneg %p1347_p8  ;;  %s29_s29 = ssub.s32 %s1267_s18, %s1360_s27 }
  0x13   : > { %s1079_s6 = scalar_lea.hbm %s1653_s1, 2048 }
  0x14   : > { %p1355_p10 = pnand %p978_p9, %p1657_p1  ;;  %p1080_p11 = scmp.ne.s32.totalorder %s1653_s1, %s1079_s6 }
  0x15   : > { %p1086_p3 = scmp.lt.u32.totalorder %s1079_s6, %s1653_s1 }
  0x16   : > { %p1081_p12 = pneg %p1355_p10 }
  0x18   : > { %p1082_p13 = pnand %p1081_p12, %p1080_p11 }
  0x1a   : > { %p1083_p0 = pneg %p1082_p13 }
  0x1c   : > { %p1088_p5 = pnand %p1086_p3, %p1083_p0 }
  0x1e   : > { %1091 = shalt.err (!%p1088_p5)
}
  0x1f   : > { %s1092_s11 = scalar_lea.vmem %s168_s25, 2048  ;;  %p1100_p2 = scmp.lt.s32.totalorder %s168_s25, %s168_s25 }
  0x20   : > { %p1093_p7 = scmp.ne.s32.totalorder %s168_s25, %s1092_s11  ;;  %p1101_p6 = scmp.lt.s32.totalorder %s1092_s11, %s1092_s11 }
  0x22   : > { %p1095_p9 = pnand %p1093_p7, %p1081_p12  ;;  %p1102_p4 = por %p1101_p6, %p1100_p2 }
  0x24   : > { %p1096_p1 = pneg %p1095_p9 }
  0x26   : > { %p1103_p8 = pnand %p1102_p4, %p1096_p1 }
  0x28   : > { %1106 = shalt.err (!%p1103_p8)
}
  0x29   : > { %s1270_s12 = smov 64   ;;  %s1271_s13 = smov 4  }
  0x2a   : > { %981 = dma.hbm_to_vmem [thread:$0]  (!%p1355_p10), %s1653_s1, 2048, %s168_s25, [#allocation6], %s1270_s12, %s1270_s12, %s1271_s13  }
  0x2b   : > { %p30_p11 = scmp.eq.s32.totalorder %s29_s29, 0  ;;  %p39_p2 = scmp.ne.s32.totalorder %s1263_s17, %s1259_s16 }
  0x2c   : > { %p40_p1 = scmp.eq.s32.totalorder %s1267_s18, 0  ;;  %p997_p4 = scmp.lt.s32.totalorder %s1267_s18, 4 }
  0x2d   : > { %s1386_s30 = scalar_select %p30_p11, %s1263_s17, %s32_s28  }
  0x2e   : > { %p41_p6 = por %p40_p1, %p39_p2  ;;  %p1664_p8 = scmp.eq.s32.totalorder %s1326_s19, 3 }
  0x2f   : > { %s181_s6 = sand.u32 1, %s1263_s17   ;;  %s884_s7 = sshll.u32 %s1267_s18, 11 }
  0x30   : > { %p1390_p12 = por %p1664_p8, %p39_p2  ;;  %s836_s8 = sshll.u32 %s181_s6, 7 }
  0x31   : > { %s1399_s10 = scalar_lea.hbm %s1652_s0, %s884_s7  ;;  %s185_s25 = scalar_lea.vmem [#allocation2], %s836_s8 }
  0x32   : > { %s193_s28 = sshll.u32 %s185_s25, 4  ;;  %p1401_p10 = pnand %p997_p4, %p41_p6  ;;  %s1405_s28 = int_to_ptr.vmem [resolvable:$true] %s193_s28 }
  0x33   : > { %s1407_s11 = scalar_lea.sflag [#allocation3], %s181_s6  ;;  %s1107_s12 = scalar_lea.hbm %s1399_s10, 2048 }
  0x34   : > { %p1108_p13 = scmp.ne.s32.totalorder %s1399_s10, %s1107_s12  ;;  %p1109_p0 = pneg %p1401_p10 }
  0x35   : > { %s1112_s24 = scalar_lea.hbm %s1652_s0, 8192  ;;  %p1113_p7 = scmp.lt.u32.totalorder %s1399_s10, %s1652_s0 }
  0x36   : > { %p1110_p3 = pnand %p1109_p0, %p1108_p13  ;;  %p1114_p9 = scmp.lt.u32.totalorder %s1112_s24, %s1107_s12 }
  0x37   : > { %p1116_p2 = scmp.lt.u32.totalorder %s1107_s12, %s1399_s10 }
  0x38   : > { %p1111_p5 = pneg %p1110_p3  ;;  %p1115_p11 = por %p1114_p9, %p1113_p7 }
  0x3a   : > { %p1117_p1 = por %p1116_p2, %p1115_p11 }
  0x3c   : > { %p1118_p4 = pnand %p1117_p1, %p1111_p5 }
  0x3e   : > { %1121 = shalt.err (!%p1118_p4)
}
  0x3f   : > { %s1122_s6 = scalar_lea.vmem %s1405_s28, 2048  ;;  %s1272_s26 = smov [#allocation2]  }
  0x40   : > { %p1123_p6 = scmp.ne.s32.totalorder %s1405_s28, %s1122_s6  ;;  %s1127_s9 = sshll.u32 %s1272_s26, 4  ;;  %s1128_s9 = int_to_ptr.vmem [resolvable:$false] %s1127_s9 }
  0x41   : > { %s1129_s25 = scalar_lea.vmem %s1128_s9, 4096  ;;  %p1130_p3 = scmp.lt.s32.totalorder %s1405_s28, %s1128_s9 }
  0x42   : > { %p1125_p8 = pnand %p1123_p6, %p1109_p0  ;;  %p1131_p7 = scmp.lt.s32.totalorder %s1129_s25, %s1122_s6 }
  0x44   : > { %p1126_p13 = pneg %p1125_p8  ;;  %p1132_p9 = por %p1131_p7, %p1130_p3 }
  0x46   : > { %p1133_p11 = pnand %p1132_p9, %p1126_p13 }
  0x48   : > { %1136 = shalt.err (!%p1133_p11)
}
  0x49   : > { %s1273_s12 = smov 128   ;;  %s1274_s13 = smov 8  }
  0x4a   : > { %985 = dma.hbm_to_vmem [thread:$0]  (!%p1401_p10), %s1399_s10, 2048, %s1405_s28, %s1407_s11, %s1273_s12, %s1273_s12, %s1274_s13  }
  0x4b   : > { %p1667_p0 = scmp.ne.s32.totalorder %s1662_s23, 0 }
  0x4c   : > { %s1438_s14 = sand.u32 (!%p1667_p0), 1, %s1259_s16   ;;  %p1668_p5 = scmp.ne.s32.totalorder (!%p1667_p0), %s1660_s21, 0 }
  0x4d   : > { %205 = sbr.rel (%p1667_p0) target bundleno = 439 (0x1b7), region = 28  ;;  %s841_s24 = sshll.u32 (!%p1667_p0), %s1438_s14, 7 }
  0x4e   : > { %s208_s7 = scalar_lea.sflag (!%p1667_p0), [#allocation3], %s1438_s14  ;;  %s1444_s8 = scalar_lea.vmem (!%p1667_p0), [#allocation2], %s841_s24 }
  0x54   : > { %1238 = dma.done.wait (%p1668_p5), %s208_s7, 2048  }
  0x55   : > { %1240 = vsyncadd (%p1668_p5), %s208_s7, 4294965248  ;;  %p1669_p10 = scmp.eq.s32.totalorder %s1326_s19, 0 }
  0x57   : > { %1242 = dma.done.wait (%p1669_p10), [#allocation6], 2048   ;;  %p1670_p2 = pmov %p1669_p10 }
  0x58   : > { %v1039_v0 = vld [vmem:[#allocation5 + $0x40] sm:$0xff]   ;;  %v1041_v2 = vld [vmem:[#allocation5 + $0x48] sm:$0xff]   ;;  %v1043_v4 = vld [vmem:[#allocation5 + $0x50] sm:$0xff]   ;;  %s1474_s21 = scalar_lea.vmem [#allocation7], %s841_s24  ;;  %s885_s23 = sshll.u32 %s1326_s19, 11 }
  0x59   : > { %1244 = vsyncadd (%p1670_p2), [#allocation6], 4294965248  ;;  %v1040_v1 = vld [vmem:[#allocation5] sm:$0xff]   ;;  %886 = vmatprep.subr.bf16.mxu0 %v1039_v0  ;;  %950 = vmatprep.subr.bf16.mxu1 %v1039_v0  ;;  %v1042_v3 = vld [vmem:[#allocation5 + $0x8] sm:$0xff]   ;;  %s670_s10 = sshll.u32 %s1474_s21, 4  ;;  %s1514_s11 = scalar_lea.hbm %s1654_s2, %s885_s23  ;;  %s1516_s10 = int_to_ptr.vmem [resolvable:$true] %s670_s10 }
  0x5a   : > { %887 = vmatpush3.bf16.msra.mxu0 %v1040_v1  ;;  %958 = vmatpush3.bf16.msra.mxu1 %v1040_v1  ;;  %v1044_v5 = vld [vmem:[#allocation5 + $0x10] sm:$0xff]   ;;  %v1045_v6 = vld [vmem:[#allocation5 + $0x58] sm:$0xff]   ;;  %v1047_v8 = vld [vmem:[#allocation5 + $0x60] sm:$0xff]   ;;  %s649_s6 = scalar_lea.sflag [#allocation4], %s1438_s14  ;;  %s1137_s26 = scalar_lea.vmem %s1516_s10, 2048 }
  0x5b   : > { %888 = vmatprep.subr.bf16.mxu0 %v1041_v2  ;;  %951 = vmatprep.subr.bf16.mxu1 %v1041_v2  ;;  %v1046_v7 = vld [vmem:[#allocation5 + $0x18] sm:$0xff]   ;;  %v1048_v9 = vld [vmem:[#allocation5 + $0x20] sm:$0xff]   ;;  %v1049_v10 = vld [vmem:[#allocation5 + $0x68] sm:$0xff]   ;;  %p1138_p1 = scmp.ne.s32.totalorder %s1516_s10, %s1137_s26  ;;  %s1275_s9 = smov [#allocation7]  }
  0x5c   : > { %v1057_v11 = vld [vmem:[%s1444_s8 + $0x4] ss:$8 sps:$4 sm:$0xff]   ;;  %v1051_v14 = vld [vmem:[#allocation5 + $0x70] sm:$0xff]   ;;  %v1053_v16 = vld [vmem:[#allocation5 + $0x78] sm:$0xff]   ;;  %s1141_s25 = sshll.u32 %s1275_s9, 4  ;;  %s1142_s25 = int_to_ptr.vmem [resolvable:$false] %s1141_s25 }
  0x5d   : > { %v1050_v12 = vld [vmem:[#allocation5 + $0x28] sm:$0xff]   ;;  %507 = vmatprep.mubr.bf16.mxu0 %v1057_v11  ;;  %v1052_v15 = vld [vmem:[#allocation5 + $0x30] sm:$0xff]   ;;  %v1054_v17 = vld [vmem:[#allocation5 + $0x38] sm:$0xff]   ;;  %p1139_p4 = pnand %p1138_p1, %p1390_p12  ;;  %s1143_s12 = scalar_lea.vmem %s1142_s25, 4096 }
  0x5e   : > { %889 = vmatpush3.bf16.msra.mxu0 %v1042_v3  ;;  %959 = vmatpush3.bf16.msra.mxu1 %v1042_v3  ;;  %v1063_v13 = vld [vmem:[%s1444_s8 + $0x44] ss:$8 sps:$4 sm:$0xff]   ;;  %v1055_v18 = vld [vmem:[%s1444_s8] ss:$8 sps:$4 sm:$0xff]   ;;  %v1058_v20 = vld [vmem:[%s1444_s8 + $0x14] ss:$8 sps:$4 sm:$0xff]   ;;  %p1144_p8 = scmp.lt.s32.totalorder %s1516_s10, %s1142_s25  ;;  %p1145_p13 = scmp.lt.s32.totalorder %s1143_s12, %s1137_s26 }
  0x5f   : > { %890 = vmatprep.subr.bf16.mxu0 %v1043_v4  ;;  %952 = vmatprep.subr.bf16.mxu1 %v1043_v4  ;;  %v1061_v19 = vld [vmem:[%s1444_s8 + $0x40] ss:$8 sps:$4 sm:$0xff]   ;;  %v1067_v21 = vld [vmem:[%s1444_s8 + $0x54] ss:$8 sps:$4 sm:$0xff]   ;;  %v1060_v22 = vld [vmem:[%s1444_s8 + $0x10] ss:$8 sps:$4 sm:$0xff]   ;;  %p1140_p6 = pneg %p1139_p4 }
  0x60   : > { %539 = vmatprep.mubr.bf16.mxu1 %v1063_v13  ;;  %v1069_v23 = vld [vmem:[%s1444_s8 + $0x50] ss:$8 sps:$4 sm:$0xff]   ;;  %v1064_v24 = vld [vmem:[%s1444_s8 + $0x24] ss:$8 sps:$4 sm:$0xff]   ;;  %v1066_v26 = vld [vmem:[%s1444_s8 + $0x20] ss:$8 sps:$4 sm:$0xff]   ;;  %p1146_p3 = por %p1145_p13, %p1144_p8 }
  0x61   : > { %v1073_v25 = vld [vmem:[%s1444_s8 + $0x64] ss:$8 sps:$4 sm:$0xff]   ;;  %v1075_v27 = vld [vmem:[%s1444_s8 + $0x60] ss:$8 sps:$4 sm:$0xff]   ;;  %v1070_v28 = vld [vmem:[%s1444_s8 + $0x34] ss:$8 sps:$4 sm:$0xff]  }
  0x62   : > { %891 = vmatpush3.bf16.msra.mxu0 %v1044_v5  ;;  %960 = vmatpush3.bf16.msra.mxu1 %v1044_v5  ;;  %v1076_v29 = vld [vmem:[%s1444_s8 + $0x74] ss:$8 sps:$4 sm:$0xff]   ;;  %v1072_v30 = vld [vmem:[%s1444_s8 + $0x30] ss:$8 sps:$4 sm:$0xff]   ;;  %p1147_p7 = pnand %p1146_p3, %p1140_p6 }
  0x63   : > { %892 = vmatprep.subr.bf16.mxu0 %v1045_v6  ;;  %953 = vmatprep.subr.bf16.mxu1 %v1045_v6  ;;  %v1078_v31 = vld [vmem:[%s1444_s8 + $0x70] ss:$8 sps:$4 sm:$0xff]  }
  0x66   : > { %893 = vmatpush3.bf16.msra.mxu0 %v1046_v7  ;;  %961 = vmatpush3.bf16.msra.mxu1 %v1046_v7 }
  0x67   : > { %894 = vmatprep.subr.bf16.mxu0 %v1047_v8  ;;  %954 = vmatprep.subr.bf16.mxu1 %v1047_v8 }
  0x6a   : > { %895 = vmatpush3.bf16.msra.mxu0 %v1048_v9  ;;  %962 = vmatpush3.bf16.msra.mxu1 %v1048_v9 }
  0x6b   : > { %896 = vmatprep.subr.bf16.mxu0 %v1049_v10  ;;  %955 = vmatprep.subr.bf16.mxu1 %v1049_v10 }
  0x6e   : > { %897 = vmatpush3.bf16.msra.mxu0 %v1050_v12  ;;  %963 = vmatpush3.bf16.msra.mxu1 %v1050_v12 }
  0x6f   : > { %898 = vmatprep.subr.bf16.mxu0 %v1051_v14  ;;  %956 = vmatprep.subr.bf16.mxu1 %v1051_v14 }
  0x72   : > { %899 = vmatpush3.bf16.msra.mxu0 %v1052_v15  ;;  %964 = vmatpush3.bf16.msra.mxu1 %v1052_v15 }
  0x73   : > { %900 = vmatprep.subr.bf16.mxu0 %v1053_v16  ;;  %957 = vmatprep.subr.bf16.mxu1 %v1053_v16 }
  0x76   : > { %901 = vmatpush3.bf16.msra.mxu0 %v1054_v17  ;;  %965 = vmatpush3.bf16.msra.mxu1 %v1054_v17 }
  0x79   : > { %508 = vmatmul.mubr.bf16.vlgmr.msra.gmra.mrb[0].mxu0 %v1055_v18  ;;  %540 = vmatmul.mubr.bf16.vlgmr.msra.gmra.mrb[0].mxu1 %v1061_v19 }
  0x7a   : > { %515 = vmatprep.mubr.bf16.mxu0 %v1058_v20  ;;  %547 = vmatprep.mubr.bf16.mxu1 %v1067_v21 }
  0x81   : > { %516 = vmatmul.mubr.bf16.gmra.mrb[4].mxu0 %v1060_v22  ;;  %548 = vmatmul.mubr.bf16.gmra.mrb[4].mxu1 %v1069_v23 }
  0x82   : > { %523 = vmatprep.mubr.bf16.mxu0 %v1064_v24  ;;  %555 = vmatprep.mubr.bf16.mxu1 %v1073_v25 }
  0x89   : > { %524 = vmatmul.mubr.bf16.gmra.mrb[8].mxu0 %v1066_v26  ;;  %556 = vmatmul.mubr.bf16.gmra.mrb[8].mxu1 %v1075_v27 }
  0x8a   : > { %531 = vmatprep.mubr.bf16.mxu0 %v1070_v28  ;;  %563 = vmatprep.mubr.bf16.mxu1 %v1076_v29 }
  0x91   : > { %532 = vmatmul.mubr.bf16.gmra.mrb[12].mxu0 %v1072_v30  ;;  %564 = vmatmul.mubr.bf16.gmra.mrb[12].mxu1 %v1078_v31 }
 0x14c   : > { %v902_v32 = vpop.f32.mrb[0].mxu0  ;;  %v926_v33 = vpop.f32.mrb[0].mxu1 }
 0x14d   : > { %v903_v34 = vpop.f32.mrb[1].mxu0  ;;  %v927_v35 = vpop.f32.mrb[1].mxu1 }
 0x14e   : > { %v904_v36 = vadd.f32 %v903_v34, %v902_v32  ;;  %v905_v37 = vpop.f32.mrb[2].mxu0  ;;  %v1470_v38 = vadd.f32 %v927_v35, %v926_v33  ;;  %v929_v39 = vpop.f32.mrb[2].mxu1 }
 0x14f   : > { %v906_v40 = vpop.f32.mrb[3].mxu0  ;;  %v930_v41 = vpop.f32.mrb[3].mxu1 }
 0x150   : > { %572 = vst [vmem:[%s1474_s21] sm:$0xff] %v904_v36  ;;  %v907_v42 = vadd.f32 %v906_v40, %v905_v37  ;;  %580 = vst [vmem:[%s1474_s21 + $0x40] sm:$0xff] %v1470_v38  ;;  %v1479_v43 = vadd.f32 %v930_v41, %v929_v39  ;;  %v610_v44 = vmul.f32 %v904_v36, %v904_v36 }
 0x151   : > { %v618_v37 = vmul.f32 %v1470_v38, %v1470_v38 }
 0x152   : > { %573 = vst [vmem:[%s1474_s21 + $0x8] sm:$0xff] %v907_v42  ;;  %v588_v45 = vadd.f32 %v907_v42, %v904_v36  ;;  %v611_v46 = vmul.f32 %v907_v42, %v907_v42  ;;  %581 = vst [vmem:[%s1474_s21 + $0x48] sm:$0xff] %v1479_v43 }
 0x154   : > { %v626_v47 = vadd.f32 %v611_v46, %v610_v44  ;;  %v908_v48 = vpop.f32.mrb[4].mxu0  ;;  %v932_v49 = vpop.f32.mrb[4].mxu1 }
 0x155   : > { %v909_v50 = vpop.f32.mrb[5].mxu0  ;;  %v933_v51 = vpop.f32.mrb[5].mxu1 }
 0x156   : > { %v910_v52 = vadd.f32 %v909_v50, %v908_v48  ;;  %v911_v53 = vpop.f32.mrb[6].mxu0  ;;  %v1484_v54 = vadd.f32 %v933_v51, %v932_v49  ;;  %v935_v55 = vpop.f32.mrb[6].mxu1 }
 0x157   : > { %v912_v56 = vpop.f32.mrb[7].mxu0  ;;  %v936_v57 = vpop.f32.mrb[7].mxu1 }
 0x158   : > { %574 = vst [vmem:[%s1474_s21 + $0x10] sm:$0xff] %v910_v52  ;;  %v589_v58 = vadd.f32 %v910_v52, %v588_v45  ;;  %v612_v59 = vmul.f32 %v910_v52, %v910_v52  ;;  %v913_v60 = vadd.f32 %v912_v56, %v911_v53  ;;  %582 = vst [vmem:[%s1474_s21 + $0x50] sm:$0xff] %v1484_v54 }
 0x159   : > { %v1489_v61 = vadd.f32 %v936_v57, %v935_v55 }
 0x15a   : > { %v627_v62 = vadd.f32 %v626_v47, %v612_v59  ;;  %575 = vst [vmem:[%s1474_s21 + $0x18] sm:$0xff] %v913_v60  ;;  %v590_v63 = vadd.f32 %v913_v60, %v589_v58  ;;  %v613_v0 = vmul.f32 %v913_v60, %v913_v60 }
 0x15b   : > { %583 = vst [vmem:[%s1474_s21 + $0x58] sm:$0xff] %v1489_v61 }
 0x15c   : > { %v628_v1 = vadd.f32 %v627_v62, %v613_v0  ;;  %v914_v2 = vpop.f32.mrb[8].mxu0  ;;  %v938_v3 = vpop.f32.mrb[8].mxu1 }
 0x15d   : > { %v915_v4 = vpop.f32.mrb[9].mxu0  ;;  %v939_v5 = vpop.f32.mrb[9].mxu1 }
 0x15e   : > { %v916_v6 = vadd.f32 %v915_v4, %v914_v2  ;;  %v917_v7 = vpop.f32.mrb[10].mxu0  ;;  %v1494_v8 = vadd.f32 %v939_v5, %v938_v3  ;;  %v941_v9 = vpop.f32.mrb[10].mxu1 }
 0x15f   : > { %v918_v10 = vpop.f32.mrb[11].mxu0  ;;  %v942_v11 = vpop.f32.mrb[11].mxu1 }
 0x160   : > { %576 = vst [vmem:[%s1474_s21 + $0x20] sm:$0xff] %v916_v6  ;;  %v591_v12 = vadd.f32 %v916_v6, %v590_v63  ;;  %v614_v13 = vmul.f32 %v916_v6, %v916_v6  ;;  %v919_v14 = vadd.f32 %v918_v10, %v917_v7  ;;  %584 = vst [vmem:[%s1474_s21 + $0x60] sm:$0xff] %v1494_v8 }
 0x161   : > { %v1499_v15 = vadd.f32 %v942_v11, %v941_v9 }
 0x162   : > { %v629_v16 = vadd.f32 %v628_v1, %v614_v13  ;;  %577 = vst [vmem:[%s1474_s21 + $0x28] sm:$0xff] %v919_v14  ;;  %v592_v17 = vadd.f32 %v919_v14, %v591_v12  ;;  %v615_v18 = vmul.f32 %v919_v14, %v919_v14 }
 0x163   : > { %585 = vst [vmem:[%s1474_s21 + $0x68] sm:$0xff] %v1499_v15 }
 0x164   : > { %v630_v19 = vadd.f32 %v629_v16, %v615_v18  ;;  %v920_v20 = vpop.f32.mrb[12].mxu0  ;;  %v944_v21 = vpop.f32.mrb[12].mxu1 }
 0x165   : > { %v921_v22 = vpop.f32.mrb[13].mxu0  ;;  %v945_v23 = vpop.f32.mrb[13].mxu1 }
 0x166   : > { %v922_v24 = vadd.f32 %v921_v22, %v920_v20  ;;  %v923_v25 = vpop.f32.mrb[14].mxu0  ;;  %v1506_v26 = vadd.f32 %v945_v23, %v944_v21  ;;  %v947_v27 = vpop.f32.mrb[14].mxu1 }
 0x167   : > { %v924_v28 = vpop.f32.mrb[15].mxu0  ;;  %v948_v29 = vpop.f32.mrb[15].mxu1 }
 0x168   : > { %578 = vst [vmem:[%s1474_s21 + $0x30] sm:$0xff] %v922_v24  ;;  %v593_v30 = vadd.f32 %v922_v24, %v592_v17  ;;  %v616_v31 = vmul.f32 %v922_v24, %v922_v24  ;;  %v925_v32 = vadd.f32 %v924_v28, %v923_v25  ;;  %586 = vst [vmem:[%s1474_s21 + $0x70] sm:$0xff] %v1506_v26 }
 0x169   : > { %v949_v33 = vadd.f32 %v948_v29, %v947_v27 }
 0x16a   : > { %v631_v34 = vadd.f32 %v630_v19, %v616_v31  ;;  %579 = vst [vmem:[%s1474_s21 + $0x38] sm:$0xff] %v925_v32  ;;  %v594_v35 = vadd.f32 %v925_v32, %v593_v30  ;;  %v617_v36 = vmul.f32 %v925_v32, %v925_v32 }
 0x16b   : > { %587 = vst [vmem:[%s1474_s21 + $0x78] sm:$0xff] %v949_v33 }
 0x16c   : > { %v595_v39 = vadd.f32 %v1470_v38, %v594_v35  ;;  %v632_v40 = vadd.f32 %v631_v34, %v617_v36 }
 0x16d   : > { %1150 = shalt.err (!%p1147_p7)
}
 0x16e   : > { %s1151_s13 = scalar_lea.hbm %s1514_s11, 2048  ;;  %s1155_s8 = scalar_lea.hbm %s1654_s2, 8192 }
 0x16f   : > { %p1152_p9 = scmp.ne.s32.totalorder %s1514_s11, %s1151_s13  ;;  %p1156_p5 = scmp.lt.u32.totalorder %s1514_s11, %s1654_s2 }
 0x170   : > { %p1157_p10 = scmp.lt.u32.totalorder %s1155_s8, %s1151_s13  ;;  %p1159_p1 = scmp.lt.u32.totalorder %s1151_s13, %s1514_s11 }
 0x171   : > { %p1153_p11 = pnand %p1152_p9, %p1390_p12 }
 0x172   : > { %p1158_p2 = por %p1157_p10, %p1156_p5 }
 0x173   : > { %p1154_p0 = pneg %p1153_p11 }
 0x174   : > { %p1160_p4 = por %p1159_p1, %p1158_p2 }
 0x176   : > { %p1161_p6 = pnand %p1160_p4, %p1154_p0 }
 0x178   : > { %1164 = shalt.err (!%p1161_p6)
}
 0x179   : > { %s1276_s28 = smov 128   ;;  %s1277_s29 = smov 8   ;;  %v619_v38 = vmul.f32 %v1479_v43, %v1479_v43  ;;  %v596_v41 = vadd.f32 %v1479_v43, %v595_v39  ;;  %v633_v42 = vadd.f32 %v632_v40, %v618_v37  ;;  %v620_v44 = vmul.f32 %v1484_v54, %v1484_v54 }
 0x17a   : > { %972 = dma.vmem_to_hbm [thread:$0]  (%p1390_p12), %s1516_s10, 2048, %s1514_s11, %s649_s6, %s1276_s28, %s1276_s28, %s1277_s29   ;;  %v621_v47 = vmul.f32 %v1489_v61, %v1489_v61  ;;  %v622_v51 = vmul.f32 %v1494_v8, %v1494_v8  ;;  %v623_v55 = vmul.f32 %v1499_v15, %v1499_v15  ;;  %v625_v60 = vmul.f32 %v949_v33, %v949_v33 }
 0x17b   : > { %v634_v45 = vadd.f32 %v633_v42, %v619_v38  ;;  %v597_v46 = vadd.f32 %v1484_v54, %v596_v41  ;;  %v624_v54 = vmul.f32 %v1506_v26, %v1506_v26  ;;  %s653_s10 = sand.u32 1, %s1326_s19   ;;  %s879_s11 = sshll.u32 %s1326_s19, 4 }
 0x17c   : > { %s241_s6 = scalar_lea.vmem [#allocation8], %s1438_s14  ;;  %s247_s9 = scalar_lea.vmem [#allocation10], %s1438_s14 }
 0x17d   : > { %v598_v48 = vadd.f32 %v1489_v61, %v597_v46  ;;  %v635_v49 = vadd.f32 %v634_v45, %v620_v44  ;;  %s686_s26 = sshll.u32 %s241_s6, 4  ;;  %s699_s25 = sshll.u32 %s247_s9, 4  ;;  %s1576_s26 = int_to_ptr.vmem [resolvable:$true] %s686_s26  ;;  %s1583_s25 = int_to_ptr.vmem [resolvable:$true] %s699_s25 }
 0x17e   : > { %s1574_s24 = scalar_lea.hbm %s1655_s3, %s879_s11  ;;  %s1581_s8 = scalar_lea.hbm %s1656_s4, %s879_s11 }
 0x17f   : > { %v599_v50 = vadd.f32 %v1494_v8, %v598_v48  ;;  %v636_v52 = vadd.f32 %v635_v49, %v621_v47  ;;  %s1585_s21 = scalar_lea.sflag [#allocation9], %s653_s10  ;;  %s1165_s23 = scalar_lea.vmem %s1576_s26, 16 }
 0x180   : > { %p1166_p8 = scmp.ne.s32.totalorder %s1576_s26, %s1165_s23  ;;  %s1278_s28 = smov [#allocation8]  }
 0x181   : > { %v637_v43 = vadd.f32 %v636_v52, %v622_v51  ;;  %v600_v53 = vadd.f32 %v1499_v15, %v599_v50  ;;  %s1169_s29 = sshll.u32 %s1278_s28, 4  ;;  %s1170_s29 = int_to_ptr.vmem [resolvable:$false] %s1169_s29 }
 0x182   : > { %p1167_p13 = pnand %p1166_p8, %p1390_p12  ;;  %s1171_s12 = scalar_lea.vmem %s1170_s29, 32 }
 0x183   : > { %v638_v56 = vadd.f32 %v637_v43, %v623_v55  ;;  %v601_v57 = vadd.f32 %v1506_v26, %v600_v53  ;;  %p1172_p7 = scmp.lt.s32.totalorder %s1576_s26, %s1170_s29  ;;  %p1173_p9 = scmp.lt.s32.totalorder %s1171_s12, %s1165_s23 }
 0x184   : > { %p1168_p3 = pneg %p1167_p13 }
 0x185   : > { %v639_v58 = vadd.f32 %v638_v56, %v624_v54  ;;  %v602_v59 = vadd.f32 %v949_v33, %v601_v57  ;;  %p1174_p11 = por %p1173_p9, %p1172_p7 }
 0x187   : > { %v603_v61 = vrot.slane %v602_v59, 4  ;;  %v640_v62 = vadd.f32 %v639_v58, %v625_v60  ;;  %p1175_p0 = pnand %p1174_p11, %p1168_p3 }
 0x189   : > { %v604_v63 = vadd.f32 %v603_v61, %v602_v59  ;;  %v641_v0 = vrot.slane %v640_v62, 4 }
 0x18b   : > { %v605_v1 = vrot.slane %v604_v63, 2  ;;  %v642_v2 = vadd.f32 %v641_v0, %v640_v62 }
 0x18d   : > { %v606_v3 = vadd.f32 %v605_v1, %v604_v63  ;;  %v643_v4 = vrot.slane %v642_v2, 2 }
 0x18f   : > { %v607_v5 = vrot.slane %v606_v3, 1  ;;  %v644_v6 = vadd.f32 %v643_v4, %v642_v2 }
 0x191   : > { %v645_v7 = vrot.slane %v644_v6, 1  ;;  %v608_v8 = vadd.f32 %v607_v5, %v606_v3 }
 0x193   : > { %609 = vst [vmem:[%s241_s6] sm:$0x1] %v608_v8  ;;  %v646_v9 = vadd.f32 %v645_v7, %v644_v6 }
 0x194   : > { %1178 = shalt.err (!%p1175_p0)
}
 0x195   : > { %s1179_s10 = scalar_lea.hbm %s1574_s24, 16  ;;  %s1183_s13 = scalar_lea.hbm %s1655_s3, 64 }
 0x196   : > { %p1180_p5 = scmp.ne.s32.totalorder %s1574_s24, %s1179_s10  ;;  %p1184_p1 = scmp.lt.u32.totalorder %s1574_s24, %s1655_s3 }
 0x197   : > { %p1185_p4 = scmp.lt.u32.totalorder %s1183_s13, %s1179_s10  ;;  %p1187_p8 = scmp.lt.u32.totalorder %s1179_s10, %s1574_s24 }
 0x198   : > { %p1181_p10 = pnand %p1180_p5, %p1390_p12 }
 0x199   : > { %p1186_p6 = por %p1185_p4, %p1184_p1 }
 0x19a   : > { %p1182_p2 = pneg %p1181_p10 }
 0x19b   : > { %p1188_p13 = por %p1187_p8, %p1186_p6 }
 0x19d   : > { %p1189_p3 = pnand %p1188_p13, %p1182_p2 }
 0x19f   : > { %1192 = shalt.err (!%p1189_p3)
}
 0x1a0   : > { %973 = dma.vmem_to_hbm [thread:$0]  (%p1390_p12), %s1576_s26, 16, %s1574_s24, %s1585_s21   ;;  %647 = vst [vmem:[%s247_s9] sm:$0x1] %v646_v9 }
 0x1a1   : > { %s1193_s23 = scalar_lea.vmem %s1583_s25, 16  ;;  %s1279_s28 = smov [#allocation10]  }
 0x1a2   : > { %p1194_p7 = scmp.ne.s32.totalorder %s1583_s25, %s1193_s23  ;;  %s1197_s29 = sshll.u32 %s1279_s28, 4  ;;  %s1198_s29 = int_to_ptr.vmem [resolvable:$false] %s1197_s29 }
 0x1a3   : > { %s1199_s12 = scalar_lea.vmem %s1198_s29, 32  ;;  %p1200_p0 = scmp.lt.s32.totalorder %s1583_s25, %s1198_s29 }
 0x1a4   : > { %p1195_p9 = pnand %p1194_p7, %p1390_p12  ;;  %p1201_p5 = scmp.lt.s32.totalorder %s1199_s12, %s1193_s23 }
 0x1a6   : > { %p1196_p11 = pneg %p1195_p9  ;;  %p1202_p10 = por %p1201_p5, %p1200_p0 }
 0x1a8   : > { %p1203_p2 = pnand %p1202_p10, %p1196_p11 }
 0x1aa   : > { %1206 = shalt.err (!%p1203_p2)
}
 0x1ab   : > { %s1207_s14 = scalar_lea.hbm %s1581_s8, 16  ;;  %s1211_s24 = scalar_lea.hbm %s1656_s4, 64 }
 0x1ac   : > { %p1208_p1 = scmp.ne.s32.totalorder %s1581_s8, %s1207_s14  ;;  %p1212_p8 = scmp.lt.u32.totalorder %s1581_s8, %s1656_s4 }
 0x1ad   : > { %p1213_p13 = scmp.lt.u32.totalorder %s1211_s24, %s1207_s14  ;;  %p1215_p7 = scmp.lt.u32.totalorder %s1207_s14, %s1581_s8 }
 0x1ae   : > { %p1209_p4 = pnand %p1208_p1, %p1390_p12 }
 0x1af   : > { %p1214_p3 = por %p1213_p13, %p1212_p8 }
 0x1b0   : > { %p1210_p6 = pneg %p1209_p4 }
 0x1b1   : > { %p1216_p9 = por %p1215_p7, %p1214_p3 }
 0x1b3   : > { %p1217_p11 = pnand %p1216_p9, %p1210_p6 }
 0x1b5   : > { %1220 = shalt.err (!%p1217_p11)
}
 0x1b6   : > { %974 = dma.vmem_to_hbm [thread:$0]  (%p1390_p12), %s1583_s25, 16, %s1581_s8, %s1585_s21  }
 0x1b7 PF: > { %p999_p0 = scmp.ge.s32.totalorder %s1267_s18, 2  ;;  %s711_s6 = sand.u32 1, %s1255_s15  }
 0x1b8   : > { %p1671_p5 = scmp.ne.s32.totalorder %s1661_s22, 0  ;;  %s712_s13 = scalar_lea.sflag [#allocation4], %s711_s6 }
 0x1ba   : > { %p987_p10 = pnand %p999_p0, %p1671_p5 }
 0x1bc   : > { %1246 = dma.done.wait (!%p987_p10), %s712_s13, 2048  }
 0x1bd   : > { %1248 = vsyncadd (!%p987_p10), %s712_s13, 4294965248  ;;  %s720_s19 = sand.u32 1, %s832_s20  }
 0x1be   : > { %s721_s7 = scalar_lea.sflag [#allocation9], %s720_s19 }
 0x1bf   : > { %1250 = dma.done.wait (!%p987_p10), %s721_s7, 32  }
 0x1c0   : > { %1252 = vsyncadd (!%p987_p10), %s721_s7, 4294967264  ;;  %p22_p12 = scmp.ge.s32.totalorder %s1360_s27, 6   ;;  %s1672_s15 = smov %s1259_s16 }
 0x1c1   : > { %s1673_s16 = smov %s1263_s17  ;;  %s1674_s17 = smov %s1386_s30 }
 0x1c2   : > { %s1675_s18 = smov %s1360_s27  ;;  %24 = sbr.rel (!%p22_p12) target bundleno = 8 (0x8), region = 109 }
 0x1c9   :  { %733 = vsyncpa [#allocation3], 1 }
 0x1ca   :  { %735 = vsyncpa [#allocation3 + $0x1], 1 }
 0x1cb   :  { %736 = vsyncpa [#allocation6], 1 }
 0x1cc   :  { %737 = vsyncpa [#allocation4], 1 }
 0x1cd   :  { %739 = vsyncpa [#allocation4 + $0x1], 1 }
 0x1ce   :  { %740 = vsyncpa [#allocation9], 1 }
 0x1cf   :  { %742 = vsyncpa [#allocation9 + $0x1], 1 }

</bundles_post_ra>
